<compile_context>
chip_gen: v5e
topology: v5e:2x2
jax: 0.10.0
libtpu: 0.0.40
codegen_flags: <defaults>
</compile_context>

<pallas_src>
import jax
import jax.numpy as jnp
from jax.experimental import pallas as pl
from jax.experimental.pallas import tpu as pltpu

# Joint groups from the PyTorch module.
_TORSO = [8, 9, 10, 11]
_LEFT_LEG = [0, 1, 2, 3]
_RIGHT_LEG = [4, 5, 6, 7]
_LEFT_ARM = [12, 13, 14, 15, 16]
_RIGHT_ARM = [17, 18, 19, 20, 21]


def _output_pairs():
    # avg_pool2d(kernel=(1,2), stride implied (1,2)) over each gathered group
    # == average of consecutive pairs; trailing odd element (arms) is dropped.
    # Concat order: left_leg, right_leg, torso, left_arm, right_arm.
    pairs = []
    for group in (_LEFT_LEG, _RIGHT_LEG, _TORSO, _LEFT_ARM, _RIGHT_ARM):
        for k in range(len(group) // 2):
            pairs.append((group[2 * k], group[2 * k + 1]))
    return tuple(pairs)  # 10 pairs


_PAIRS = _output_pairs()
_P = len(_PAIRS)  # 10


def _avg_joint_kernel(x_ref, o_ref):
    # x_ref: (J, TL) — J joints on sublanes, TL lanes (multiple of 128).
    # o_ref: (P, TL) — 10 body-part rows, lane-dense output.
    # Each output row is a VPU add+mul over a lane-dense slice; no MXU, no
    # weight operand. The per-pair loop is unrolled at trace time.
    for k, (a, b) in enumerate(_PAIRS):
        s = (x_ref[a:a + 1, :].astype(jnp.float32)
             + x_ref[b:b + 1, :].astype(jnp.float32))
        o_ref[k:k + 1, :] = (0.5 * s).astype(o_ref.dtype)


def avearge_joint2(x, *, tile_lanes=8192):
    """x: (N, C, T, J) with J >= 22. Returns (N, C, T, 10), dtype preserved."""
    n, c, t, j = x.shape
    assert j >= 22, "AveargeJoint2 expects at least 22 joints on the last axis"
    m = n * c * t
    itemsize = jnp.dtype(x.dtype).itemsize

    # Transposed, lane-dense slab: (J, M). This is the only extra layout pass;
    # the kernel itself then streams full-width vregs in and out.
    xt = jnp.transpose(x.reshape(m, j))  # (j, m)

    # Lane tile: multiple of 128, clamped so we don't allocate a block far
    # larger than the array. No padding pass: Pallas masks the ragged last
    # tile's stores; garbage lanes read past the end never reach the output.
    m_pad128 = ((m + 127) // 128) * 128
    tl = min(int(tile_lanes), m_pad128)
    tl = ((tl + 127) // 128) * 128
    grid = (pl.cdiv(m, tl),)

    cost = pl.CostEstimate(
        flops=2 * m * _P,                       # 10 adds + 10 muls per row
        transcendentals=0,
        bytes_accessed=m * j * itemsize + m * _P * itemsize,
    )

    out_t = pl.pallas_call(
        _avg_joint_kernel,
        out_shape=jax.ShapeDtypeStruct((_P, m), x.dtype),
        grid_spec=pltpu.PrefetchScalarGridSpec(
            num_scalar_prefetch=0,
            grid=grid,
            in_specs=[pl.BlockSpec((j, tl), lambda i: (0, i))],
            out_specs=pl.BlockSpec((_P, tl), lambda i: (0, i)),
        ),
        compiler_params=pltpu.CompilerParams(
            dimension_semantics=("parallel",),
        ),
        cost_estimate=cost,
    )(xt)

    # Small (10, M) -> (M, 10) transpose back, then restore (N, C, T, 10).
    return jnp.transpose(out_t).reshape(n, c, t, _P)


def _reference(x):
    # Pure-JAX reference mirroring the PyTorch forward.
    cols = [(x[..., a] + x[..., b]) * 0.5 for a, b in _PAIRS]
    return jnp.stack(cols, axis=-1)


if __name__ == "__main__":
    key = jax.random.PRNGKey(0)
    # Small shapes consistent with the module: batch=2, channels=4, time=16,
    # 22 joints (H3.6M skeleton indices used by the module go up to 21).
    N, C, T, J = 2, 4, 16, 22
    x = jax.random.normal(key, (N, C, T, J), dtype=jnp.float32)

    out = avearge_joint2(x)
    out = jax.block_until_ready(out)

    ref = _reference(x)
    assert out.shape == (N, C, T, 10), out.shape
    assert out.dtype == x.dtype, out.dtype
    assert jnp.allclose(out, ref, atol=1e-5, rtol=1e-5), "mismatch vs reference"

    print("KERNEL_OK")
</pallas_src>

<mosaic_0001>
module attributes {stable_mosaic.version = 11 : i64} {
  func.func @_avg_joint_kernel(%arg0: i32, %arg1: memref<22x128xf32, #tpu.memory_space<vmem>>, %arg2: memref<10x128xf32, #tpu.memory_space<vmem>>) attributes {dimension_semantics = [#tpu.dimension_semantics<parallel>], iteration_bounds = array<i64: 1>, scalar_prefetch = 0 : i64, scratch_operands = 0 : i64, tpu.core_type = #tpu.core_type<tc>, window_params = [{transform_indices = @transform_0, window_bounds = array<i64: 22, 128>}, {transform_indices = @transform_1, window_bounds = array<i64: 10, 128>}]} {
    %c0 = arith.constant 0 : index
    %c0_0 = arith.constant 0 : index
    %0 = vector.load %arg1[%c0, %c0_0] : memref<22x128xf32, #tpu.memory_space<vmem>>, vector<1x128xf32>
    %c1 = arith.constant 1 : index
    %c0_1 = arith.constant 0 : index
    %1 = vector.load %arg1[%c1, %c0_1] : memref<22x128xf32, #tpu.memory_space<vmem>>, vector<1x128xf32>
    %2 = arith.addf %0, %1 : vector<1x128xf32>
    %cst = arith.constant 5.000000e-01 : f32
    %3 = vector.broadcast %cst : f32 to vector<1x128xf32>
    %4 = arith.mulf %3, %2 : vector<1x128xf32>
    %c0_2 = arith.constant 0 : index
    %c0_3 = arith.constant 0 : index
    %5 = vector.load %arg2[%c0_2, %c0_3] : memref<10x128xf32, #tpu.memory_space<vmem>>, vector<1x128xf32>
    tpu.vector_store %arg2[%c0_2, %c0_3], %4 {strides = array<i32>} : memref<10x128xf32, #tpu.memory_space<vmem>>, vector<1x128xf32>,
    %c2 = arith.constant 2 : index
    %c0_4 = arith.constant 0 : index
    %6 = vector.load %arg1[%c2, %c0_4] : memref<22x128xf32, #tpu.memory_space<vmem>>, vector<1x128xf32>
    %c3 = arith.constant 3 : index
    %c0_5 = arith.constant 0 : index
    %7 = vector.load %arg1[%c3, %c0_5] : memref<22x128xf32, #tpu.memory_space<vmem>>, vector<1x128xf32>
    %8 = arith.addf %6, %7 : vector<1x128xf32>
    %cst_6 = arith.constant 5.000000e-01 : f32
    %9 = vector.broadcast %cst_6 : f32 to vector<1x128xf32>
    %10 = arith.mulf %9, %8 : vector<1x128xf32>
    %c1_7 = arith.constant 1 : index
    %c0_8 = arith.constant 0 : index
    %11 = vector.load %arg2[%c1_7, %c0_8] : memref<10x128xf32, #tpu.memory_space<vmem>>, vector<1x128xf32>
    tpu.vector_store %arg2[%c1_7, %c0_8], %10 {strides = array<i32>} : memref<10x128xf32, #tpu.memory_space<vmem>>, vector<1x128xf32>,
    %c4 = arith.constant 4 : index
    %c0_9 = arith.constant 0 : index
    %12 = vector.load %arg1[%c4, %c0_9] : memref<22x128xf32, #tpu.memory_space<vmem>>, vector<1x128xf32>
    %c5 = arith.constant 5 : index
    %c0_10 = arith.constant 0 : index
    %13 = vector.load %arg1[%c5, %c0_10] : memref<22x128xf32, #tpu.memory_space<vmem>>, vector<1x128xf32>
    %14 = arith.addf %12, %13 : vector<1x128xf32>
    %cst_11 = arith.constant 5.000000e-01 : f32
    %15 = vector.broadcast %cst_11 : f32 to vector<1x128xf32>
    %16 = arith.mulf %15, %14 : vector<1x128xf32>
    %c2_12 = arith.constant 2 : index
    %c0_13 = arith.constant 0 : index
    %17 = vector.load %arg2[%c2_12, %c0_13] : memref<10x128xf32, #tpu.memory_space<vmem>>, vector<1x128xf32>
    tpu.vector_store %arg2[%c2_12, %c0_13], %16 {strides = array<i32>} : memref<10x128xf32, #tpu.memory_space<vmem>>, vector<1x128xf32>,
    %c6 = arith.constant 6 : index
    %c0_14 = arith.constant 0 : index
    %18 = vector.load %arg1[%c6, %c0_14] : memref<22x128xf32, #tpu.memory_space<vmem>>, vector<1x128xf32>
    %c7 = arith.constant 7 : index
    %c0_15 = arith.constant 0 : index
    %19 = vector.load %arg1[%c7, %c0_15] : memref<22x128xf32, #tpu.memory_space<vmem>>, vector<1x128xf32>
    %20 = arith.addf %18, %19 : vector<1x128xf32>
    %cst_16 = arith.constant 5.000000e-01 : f32
    %21 = vector.broadcast %cst_16 : f32 to vector<1x128xf32>
    %22 = arith.mulf %21, %20 : vector<1x128xf32>
    %c3_17 = arith.constant 3 : index
    %c0_18 = arith.constant 0 : index
    %23 = vector.load %arg2[%c3_17, %c0_18] : memref<10x128xf32, #tpu.memory_space<vmem>>, vector<1x128xf32>
    tpu.vector_store %arg2[%c3_17, %c0_18], %22 {strides = array<i32>} : memref<10x128xf32, #tpu.memory_space<vmem>>, vector<1x128xf32>,
    %c8 = arith.constant 8 : index
    %c0_19 = arith.constant 0 : index
    %24 = vector.load %arg1[%c8, %c0_19] : memref<22x128xf32, #tpu.memory_space<vmem>>, vector<1x128xf32>
    %c9 = arith.constant 9 : index
    %c0_20 = arith.constant 0 : index
    %25 = vector.load %arg1[%c9, %c0_20] : memref<22x128xf32, #tpu.memory_space<vmem>>, vector<1x128xf32>
    %26 = arith.addf %24, %25 : vector<1x128xf32>
    %cst_21 = arith.constant 5.000000e-01 : f32
    %27 = vector.broadcast %cst_21 : f32 to vector<1x128xf32>
    %28 = arith.mulf %27, %26 : vector<1x128xf32>
    %c4_22 = arith.constant 4 : index
    %c0_23 = arith.constant 0 : index
    %29 = vector.load %arg2[%c4_22, %c0_23] : memref<10x128xf32, #tpu.memory_space<vmem>>, vector<1x128xf32>
    tpu.vector_store %arg2[%c4_22, %c0_23], %28 {strides = array<i32>} : memref<10x128xf32, #tpu.memory_space<vmem>>, vector<1x128xf32>,
    %c10 = arith.constant 10 : index
    %c0_24 = arith.constant 0 : index
    %30 = vector.load %arg1[%c10, %c0_24] : memref<22x128xf32, #tpu.memory_space<vmem>>, vector<1x128xf32>
    %c11 = arith.constant 11 : index
    %c0_25 = arith.constant 0 : index
    %31 = vector.load %arg1[%c11, %c0_25] : memref<22x128xf32, #tpu.memory_space<vmem>>, vector<1x128xf32>
    %32 = arith.addf %30, %31 : vector<1x128xf32>
    %cst_26 = arith.constant 5.000000e-01 : f32
    %33 = vector.broadcast %cst_26 : f32 to vector<1x128xf32>
    %34 = arith.mulf %33, %32 : vector<1x128xf32>
    %c5_27 = arith.constant 5 : index
    %c0_28 = arith.constant 0 : index
    %35 = vector.load %arg2[%c5_27, %c0_28] : memref<10x128xf32, #tpu.memory_space<vmem>>, vector<1x128xf32>
    tpu.vector_store %arg2[%c5_27, %c0_28], %34 {strides = array<i32>} : memref<10x128xf32, #tpu.memory_space<vmem>>, vector<1x128xf32>,
    %c12 = arith.constant 12 : index
    %c0_29 = arith.constant 0 : index
    %36 = vector.load %arg1[%c12, %c0_29] : memref<22x128xf32, #tpu.memory_space<vmem>>, vector<1x128xf32>
    %c13 = arith.constant 13 : index
    %c0_30 = arith.constant 0 : index
    %37 = vector.load %arg1[%c13, %c0_30] : memref<22x128xf32, #tpu.memory_space<vmem>>, vector<1x128xf32>
    %38 = arith.addf %36, %37 : vector<1x128xf32>
    %cst_31 = arith.constant 5.000000e-01 : f32
    %39 = vector.broadcast %cst_31 : f32 to vector<1x128xf32>
    %40 = arith.mulf %39, %38 : vector<1x128xf32>
    %c6_32 = arith.constant 6 : index
    %c0_33 = arith.constant 0 : index
    %41 = vector.load %arg2[%c6_32, %c0_33] : memref<10x128xf32, #tpu.memory_space<vmem>>, vector<1x128xf32>
    tpu.vector_store %arg2[%c6_32, %c0_33], %40 {strides = array<i32>} : memref<10x128xf32, #tpu.memory_space<vmem>>, vector<1x128xf32>,
    %c14 = arith.constant 14 : index
    %c0_34 = arith.constant 0 : index
    %42 = vector.load %arg1[%c14, %c0_34] : memref<22x128xf32, #tpu.memory_space<vmem>>, vector<1x128xf32>
    %c15 = arith.constant 15 : index
    %c0_35 = arith.constant 0 : index
    %43 = vector.load %arg1[%c15, %c0_35] : memref<22x128xf32, #tpu.memory_space<vmem>>, vector<1x128xf32>
    %44 = arith.addf %42, %43 : vector<1x128xf32>
    %cst_36 = arith.constant 5.000000e-01 : f32
    %45 = vector.broadcast %cst_36 : f32 to vector<1x128xf32>
    %46 = arith.mulf %45, %44 : vector<1x128xf32>
    %c7_37 = arith.constant 7 : index
    %c0_38 = arith.constant 0 : index
    %47 = vector.load %arg2[%c7_37, %c0_38] : memref<10x128xf32, #tpu.memory_space<vmem>>, vector<1x128xf32>
    tpu.vector_store %arg2[%c7_37, %c0_38], %46 {strides = array<i32>} : memref<10x128xf32, #tpu.memory_space<vmem>>, vector<1x128xf32>,
    %c17 = arith.constant 17 : index
    %c0_39 = arith.constant 0 : index
    %48 = vector.load %arg1[%c17, %c0_39] : memref<22x128xf32, #tpu.memory_space<vmem>>, vector<1x128xf32>
    %c18 = arith.constant 18 : index
    %c0_40 = arith.constant 0 : index
    %49 = vector.load %arg1[%c18, %c0_40] : memref<22x128xf32, #tpu.memory_space<vmem>>, vector<1x128xf32>
    %50 = arith.addf %48, %49 : vector<1x128xf32>
    %cst_41 = arith.constant 5.000000e-01 : f32
    %51 = vector.broadcast %cst_41 : f32 to vector<1x128xf32>
    %52 = arith.mulf %51, %50 : vector<1x128xf32>
    %c8_42 = arith.constant 8 : index
    %c0_43 = arith.constant 0 : index
    %53 = vector.load %arg2[%c8_42, %c0_43] : memref<10x128xf32, #tpu.memory_space<vmem>>, vector<1x128xf32>
    tpu.vector_store %arg2[%c8_42, %c0_43], %52 {strides = array<i32>} : memref<10x128xf32, #tpu.memory_space<vmem>>, vector<1x128xf32>,
    %c19 = arith.constant 19 : index
    %c0_44 = arith.constant 0 : index
    %54 = vector.load %arg1[%c19, %c0_44] : memref<22x128xf32, #tpu.memory_space<vmem>>, vector<1x128xf32>
    %c20 = arith.constant 20 : index
    %c0_45 = arith.constant 0 : index
    %55 = vector.load %arg1[%c20, %c0_45] : memref<22x128xf32, #tpu.memory_space<vmem>>, vector<1x128xf32>
    %56 = arith.addf %54, %55 : vector<1x128xf32>
    %cst_46 = arith.constant 5.000000e-01 : f32
    %57 = vector.broadcast %cst_46 : f32 to vector<1x128xf32>
    %58 = arith.mulf %57, %56 : vector<1x128xf32>
    %c9_47 = arith.constant 9 : index
    %c0_48 = arith.constant 0 : index
    %59 = vector.load %arg2[%c9_47, %c0_48] : memref<10x128xf32, #tpu.memory_space<vmem>>, vector<1x128xf32>
    tpu.vector_store %arg2[%c9_47, %c0_48], %58 {strides = array<i32>} : memref<10x128xf32, #tpu.memory_space<vmem>>, vector<1x128xf32>,
    return
  }
  func.func @transform_0(%arg0: i32) -> (i32, i32) {
    %c0_i32 = arith.constant 0 : i32
    %c0_i32_0 = arith.constant 0 : i32
    return %c0_i32, %arg0 : i32, i32
  }
  func.func @transform_1(%arg0: i32) -> (i32, i32) {
    %c0_i32 = arith.constant 0 : i32
    %c0_i32_0 = arith.constant 0 : i32
    return %c0_i32, %arg0 : i32, i32
  }
}

</mosaic_0001>

<bundles_post_ra>
// kernel: tpu_custom_call.1
= control target key start
LH: loop header
LB: loop body
LE: loop exit
PB: predicated region body
PF: predicated region fallthrough
CT: control target
= control target key end

     0   :  { %6 = vsyncpa [#allocation3], 0  ;;  %s176_s0 = inlined_call_operand.hbm [shape: f32[22,128], index: 0, kind: input, shape index: {}]   ;;  %s177_s1 = inlined_call_operand.hbm [shape: f32[10,128], index: 1, kind: output, shape index: {}]  }
   0x1   :  { %7 = vsyncpa [#allocation4], 0  ;;  %s12_s8 = sshll.u32 %s176_s0, 4  ;;  %s150_s9 = smov [#allocation2]   ;;  %s13_s8 = int_to_ptr.hbm [resolvable:$true] %s12_s8 }
   0x2   :  { %s14_s10 = sshll.u32 %s150_s9, 4  ;;  %s151_s11 = smov 128   ;;  %s15_s10 = int_to_ptr.vmem [resolvable:$true] %s14_s10 }
   0x3   :  { %s152_s12 = smov 8  }
   0x4   :  { %20 = dma.hbm_to_vmem [thread:$0]  %s13_s8, 384, %s15_s10, [#allocation3], %s151_s11, %s151_s11, %s152_s12  }
   0x5   :  { %146 = dma.done.wait [#allocation3], 384  }
   0x6   :  { %147 = vsyncadd [#allocation3], 4294966912  ;;  %v25_v0 = vld [vmem:[#allocation2] sm:$0x1]  ;;  %v26_v1 = vld [vmem:[#allocation2 + $0x1] sm:$0x1] }
   0x7   :  { %v30_v2 = vld [vmem:[#allocation2 + $0x2] sm:$0x1]  ;;  %v27_v3 = vadd.f32 %v26_v1, %v25_v0  ;;  %v31_v4 = vld [vmem:[#allocation2 + $0x3] sm:$0x1]  ;;  %v35_v5 = vld [vmem:[#allocation2 + $0x4] sm:$0x1] }
   0x8   :  { %v36_v6 = vld [vmem:[#allocation2 + $0x5] sm:$0x1]  ;;  %v32_v7 = vadd.f32 %v31_v4, %v30_v2  ;;  %v40_v9 = vld [vmem:[#allocation2 + $0x6] sm:$0x1]  ;;  %v41_v10 = vld [vmem:[#allocation2 + $0x7] sm:$0x1] }
   0x9   :  { %v37_v8 = vadd.f32 %v36_v6, %v35_v5  ;;  %v45_v11 = vld [vmem:[#allocation2 + $0x8] sm:$0x1]  ;;  %v28_v12 = vmul.f32 0.5, %v27_v3  ;;  %v42_v13 = vadd.f32 %v41_v10, %v40_v9  ;;  %v46_v14 = vld [vmem:[#allocation2 + $0x9] sm:$0x1]  ;;  %s81_s14 = sshll.u32 %s177_s1, 4  ;;  %s82_s14 = int_to_ptr.hbm [resolvable:$true] %s81_s14 }
   0xa   :  { %v50_v15 = vld [vmem:[#allocation2 + $0xa] sm:$0x1]  ;;  %v33_v16 = vmul.f32 0.5, %v32_v7  ;;  %v47_v18 = vadd.f32 %v46_v14, %v45_v11  ;;  %v51_v19 = vld [vmem:[#allocation2 + $0xb] sm:$0x1]  ;;  %s153_s15 = smov [#allocation5]  }
   0xb   :  { %v38_v17 = vmul.f32 0.5, %v37_v8  ;;  %v55_v20 = vld [vmem:[#allocation2 + $0xc] sm:$0x1]  ;;  %29 = vst [vmem:[#allocation5] sm:$0x1] %v28_v12  ;;  %v43_v21 = vmul.f32 0.5, %v42_v13  ;;  %v52_v22 = vadd.f32 %v51_v19, %v50_v15 }
   0xc   :  { %v56_v23 = vld [vmem:[#allocation2 + $0xd] sm:$0x1]  ;;  %34 = vst [vmem:[#allocation5 + $0x1] sm:$0x1] %v33_v16  ;;  %v48_v24 = vmul.f32 0.5, %v47_v18  ;;  %s79_s16 = sshll.u32 %s153_s15, 4  ;;  %s80_s16 = int_to_ptr.vmem [resolvable:$true] %s79_s16 }
   0xd   :  { %v57_v25 = vadd.f32 %v56_v23, %v55_v20  ;;  %v60_v26 = vld [vmem:[#allocation2 + $0xe] sm:$0x1]  ;;  %39 = vst [vmem:[#allocation5 + $0x2] sm:$0x1] %v38_v17  ;;  %v53_v27 = vmul.f32 0.5, %v52_v22 }
   0xe   :  { %v61_v28 = vld [vmem:[#allocation2 + $0xf] sm:$0x1]  ;;  %44 = vst [vmem:[#allocation5 + $0x3] sm:$0x1] %v43_v21  ;;  %v65_v31 = vld [vmem:[#allocation2 + $0x11] sm:$0x1] }
   0xf   :  { %v58_v29 = vmul.f32 0.5, %v57_v25  ;;  %v62_v30 = vadd.f32 %v61_v28, %v60_v26  ;;  %49 = vst [vmem:[#allocation5 + $0x4] sm:$0x1] %v48_v24  ;;  %v66_v32 = vld [vmem:[#allocation2 + $0x12] sm:$0x1] }
  0x10   :  { %v70_v33 = vld [vmem:[#allocation2 + $0x13] sm:$0x1]  ;;  %54 = vst [vmem:[#allocation5 + $0x5] sm:$0x1] %v53_v27  ;;  %v67_v35 = vadd.f32 %v66_v32, %v65_v31  ;;  %v71_v36 = vld [vmem:[#allocation2 + $0x14] sm:$0x1] }
  0x11   :  { %v63_v34 = vmul.f32 0.5, %v62_v30  ;;  %59 = vst [vmem:[#allocation5 + $0x6] sm:$0x1] %v58_v29  ;;  %v72_v37 = vadd.f32 %v71_v36, %v70_v33 }
  0x12   :  { %v68_v38 = vmul.f32 0.5, %v67_v35 }
  0x13   :  { %64 = vst [vmem:[#allocation5 + $0x7] sm:$0x1] %v63_v34  ;;  %v73_v39 = vmul.f32 0.5, %v72_v37 }
  0x14   :  { %69 = vst [vmem:[#allocation5 + $0x8] sm:$0x1] %v68_v38 }
  0x15   :  { %74 = vst [vmem:[#allocation5 + $0x9] sm:$0x1] %v73_v39 }
  0x16   :  { %87 = dma.vmem_to_hbm [thread:$0]  %s80_s16, 256, %s82_s14, [#allocation4], %s151_s11, %s151_s11, %s152_s12  }
  0x17   :  { %148 = dma.done.wait [#allocation4], 256  }
  0x18   :  { %149 = vsyncadd [#allocation4], 4294967040 }
  0x19   :  { %92 = vsyncpa [#allocation3], 1 }
  0x1a   :  { %93 = vsyncpa [#allocation4], 1 }

</bundles_post_ra>
